<compile_context>
chip_gen: v5e
topology: v5e:2x2
jax: 0.10.0
libtpu: 0.0.40
codegen_flags: <defaults>
</compile_context>

<pallas_src>
import functools

import jax
import jax.numpy as jnp
from jax.experimental import pallas as pl
from jax.experimental.pallas import tpu as pltpu


def _round_up(n, m):
    return ((n + m - 1) // m) * m


def _round_down(n, m):
    return (n // m) * m


def _logreg_kernel(x_ref, w_ref, b_ref, o_ref, acc_ref, *, f_total, tf):
    """One (TB, TF) tile of the N=1 GEMV with fused sigmoid.

    Grid = (batch tiles ["parallel"], feature tiles ["arbitrary" reduction]).
      x_ref : [TB, TF] VMEM      w_ref : [1, TF] VMEM (torch [1, F] layout)
      b_ref : [1, 1]  SMEM       o_ref : [TB, 1] VMEM
      acc_ref: [TB, 1] f32 VMEM scratch, resident across the F axis.
    """
    k = pl.program_id(1)
    nk = pl.num_programs(1)

    @pl.when(k == 0)
    def _init():
        acc_ref[...] = jnp.zeros_like(acc_ref)

    # GEMV as VPU multiply + XLU lane reduce (an N=1 MXU column would be waste).
    # Multiply in the input dtype (no full-tile f32 cast); accumulate in f32.
    prod = x_ref[...] * w_ref[...]                              # [TB, TF]
    if f_total % tf != 0:
        # Ragged last F block: zero the out-of-range columns (garbage VMEM)
        # so they don't pollute the row sums.  All-true mask for k < last.
        col = jax.lax.broadcasted_iota(jnp.int32, prod.shape, 1)
        prod = jnp.where(col < (f_total - k * tf), prod, jnp.zeros_like(prod))
    acc_ref[...] += jnp.sum(prod, axis=-1, keepdims=True, dtype=jnp.float32)

    @pl.when(k == nk - 1)
    def _finalize():
        z = acc_ref[...] + b_ref[0, 0]                          # scalar bias (SMEM)
        # Exact, stable sigmoid: one EUP tanh; no exp overflow, no approx recip.
        y = 0.5 * (jnp.tanh(0.5 * z) + 1.0)
        o_ref[...] = y.astype(o_ref.dtype)
        # TODO(synk): lane-dense (1, TB) output slab (sublane->lane transpose)
        # would remove the masked (TB, 1) partial stores; secondary to tiling.


def logistic_regression(x, weight, bias):
    """x: [B, F]; weight: [1, F] (torch nn.Linear layout); bias: [1] -> [B, 1]."""
    B, F = x.shape
    itemsize = jnp.dtype(x.dtype).itemsize

    # Feature tiling: full rows when modest, else 2048-lane chunks reduced via
    # the f32 accumulator across the (last, "arbitrary") grid axis.
    MAX_TF = 2048
    TF = F if F <= MAX_TF else MAX_TF
    nf = pl.cdiv(F, TF)
    lane_tf = _round_up(TF, 128)                 # lane padding in VMEM
    bytes_per_row = itemsize * lane_tf

    # Batch tiling: byte-targeted (~8 MiB x tile), double-buffered x footprint
    # kept under ~24 MiB so it fits every generation once we raise the scoped
    # VMEM limit explicitly (v5e default 16 MiB, v6e/v7x default 32 MiB).
    TARGET_TILE_BYTES = 8 << 20
    X_BUDGET_BYTES = 24 << 20
    tb = min(
        _round_down(TARGET_TILE_BYTES // bytes_per_row, 8),
        _round_down((X_BUDGET_BYTES // 2) // bytes_per_row, 8),
        4096,                                    # keeps (TB,1) out/acc buffers small
    )
    TB = max(8, tb)
    TB = min(TB, _round_up(B, 8))
    # v7x megacore: ensure the "parallel" batch axis has >= 2 steps when B allows
    # so both TensorCores get work (no-op on single-TC v5e/v6e).
    if TB >= _round_up(B, 8) and B >= 16:
        TB = max(8, _round_up(pl.cdiv(B, 2), 8))
    nb = pl.cdiv(B, TB)                          # no input padding: ragged last
                                                 # block is masked by Pallas

    w = weight.reshape(1, F).astype(x.dtype)     # keep torch layout, no transpose
    b = bias.reshape(1, 1).astype(jnp.float32)   # scalar -> SMEM

    kernel = functools.partial(_logreg_kernel, f_total=F, tf=TF)

    # Rough double-buffered VMEM footprint -> explicit scoped-VMEM limit
    # (clamped so it is safe even on v7x's 64 MiB physical VMEM).
    est_vmem = (
        2 * TB * lane_tf * itemsize              # x tiles (double-buffered)
        + 2 * 8 * lane_tf * itemsize             # weight tiles (sublane-padded)
        + 3 * TB * 128 * 4                       # out (x2) + accumulator, lane-padded
    )
    vmem_limit = int(min(max(est_vmem + (4 << 20), 32 << 20), 48 << 20))

    out = pl.pallas_call(
        kernel,
        out_shape=jax.ShapeDtypeStruct((B, 1), jnp.float32),
        grid_spec=pltpu.PrefetchScalarGridSpec(
            num_scalar_prefetch=0,
            grid=(nb, nf),
            in_specs=[
                pl.BlockSpec((TB, TF), lambda i, k: (i, k)),          # x tile
                pl.BlockSpec((1, TF), lambda i, k: (0, k)),           # weight tile
                pl.BlockSpec(memory_space=pltpu.MemorySpace.SMEM),    # bias scalar
            ],
            out_specs=pl.BlockSpec((TB, 1), lambda i, k: (i, 0)),
            scratch_shapes=[pltpu.VMEM((TB, 1), jnp.float32)],
        ),
        compiler_params=pltpu.CompilerParams(
            dimension_semantics=("parallel", "arbitrary"),
            vmem_limit_bytes=vmem_limit,
        ),
        cost_estimate=pl.CostEstimate(
            flops=2 * B * F,
            transcendentals=B,
            bytes_accessed=itemsize * (B * F + F) + 4 * (B + 1),
        ),
    )(x, w, b)
    return out


if __name__ == "__main__":
    key = jax.random.PRNGKey(0)
    k_x, k_w, k_b = jax.random.split(key, 3)

    batch = 8
    n_input_features = 32

    x = jax.random.normal(k_x, (batch, n_input_features), dtype=jnp.float32)
    # Mimic nn.Linear's uniform(-1/sqrt(F), 1/sqrt(F)) init, deterministically.
    bound = float(n_input_features) ** -0.5
    weight = jax.random.uniform(
        k_w, (1, n_input_features), minval=-bound, maxval=bound, dtype=jnp.float32
    )
    bias = jax.random.uniform(
        k_b, (1,), minval=-bound, maxval=bound, dtype=jnp.float32
    )

    y = logistic_regression(x, weight, bias)
    y = jax.block_until_ready(y)

    # Pure-JAX reference: sigmoid(x @ W^T + b)
    y_ref = jax.nn.sigmoid(x @ weight.T + bias)
    assert y.shape == (batch, 1)
    assert jnp.allclose(y, y_ref, atol=1e-5, rtol=1e-5), (
        f"max abs err = {float(jnp.max(jnp.abs(y - y_ref)))}"
    )

    print("KERNEL_OK")
</pallas_src>

<mosaic_0001>
module attributes {stable_mosaic.version = 11 : i64} {
  func.func @_logreg_kernel(%arg0: i32, %arg1: i32, %arg2: memref<8x32xf32, #tpu.memory_space<vmem>>, %arg3: memref<1x32xf32, #tpu.memory_space<vmem>>, %arg4: memref<1x1xf32, #tpu.memory_space<smem>>, %arg5: memref<8x1xf32, #tpu.memory_space<vmem>>, %arg6: memref<8x1xf32, #tpu.memory_space<vmem>>) attributes {dimension_semantics = [#tpu.dimension_semantics<parallel>, #tpu.dimension_semantics<arbitrary>], iteration_bounds = array<i64: 1, 1>, scalar_prefetch = 0 : i64, scratch_operands = 1 : i64, tpu.core_type = #tpu.core_type<tc>, window_params = [{transform_indices = @transform_0, window_bounds = array<i64: 8, 32>}, {transform_indices = @transform_1, window_bounds = array<i64: 1, 32>}, {transform_indices = @transform_2, window_bounds = array<i64: 1, 1>}, {transform_indices = @transform_3, window_bounds = array<i64: 8, 1>}]} {
    %c0_i32 = arith.constant 0 : i32
    %0 = arith.cmpi eq, %arg1, %c0_i32 : i32
    %1 = arith.extui %0 : i1 to i32
    %c0_i32_0 = arith.constant 0 : i32
    %2 = arith.cmpi ne, %1, %c0_i32_0 : i32
    scf.if %2 {
      %cst_10 = arith.constant 0.000000e+00 : f32
      %15 = vector.broadcast %cst_10 : f32 to vector<8x1xf32>
      %c0_11 = arith.constant 0 : index
      %c0_12 = arith.constant 0 : index
      %16 = vector.load %arg6[%c0_11, %c0_12] : memref<8x1xf32, #tpu.memory_space<vmem>>, vector<8x1xf32>
      tpu.vector_store %arg6[%c0_11, %c0_12], %15 {strides = array<i32>} : memref<8x1xf32, #tpu.memory_space<vmem>>, vector<8x1xf32>,
    } else {
    }
    %c0 = arith.constant 0 : index
    %c0_1 = arith.constant 0 : index
    %3 = vector.load %arg2[%c0, %c0_1] : memref<8x32xf32, #tpu.memory_space<vmem>>, vector<8x32xf32>
    %c0_2 = arith.constant 0 : index
    %c0_3 = arith.constant 0 : index
    %4 = vector.load %arg3[%c0_2, %c0_3] : memref<1x32xf32, #tpu.memory_space<vmem>>, vector<1x32xf32>
    %5 = vector.broadcast %4 : vector<1x32xf32> to vector<8x32xf32>
    %6 = arith.mulf %3, %5 : vector<8x32xf32>
    %c0_4 = arith.constant 0 : index
    %c0_5 = arith.constant 0 : index
    %7 = vector.load %arg6[%c0_4, %c0_5] : memref<8x1xf32, #tpu.memory_space<vmem>>, vector<8x1xf32>
    %cst = arith.constant dense<0.000000e+00> : vector<8xf32>
    %8 = vector.multi_reduction <add>, %6, %cst [1] : vector<8x32xf32> to vector<8xf32>
    %9 = vector.shape_cast %8 : vector<8xf32> to vector<8x1xf32>
    %10 = arith.addf %7, %9 : vector<8x1xf32>
    %c0_6 = arith.constant 0 : index
    %c0_7 = arith.constant 0 : index
    %11 = vector.load %arg6[%c0_6, %c0_7] : memref<8x1xf32, #tpu.memory_space<vmem>>, vector<8x1xf32>
    tpu.vector_store %arg6[%c0_6, %c0_7], %10 {strides = array<i32>} : memref<8x1xf32, #tpu.memory_space<vmem>>, vector<8x1xf32>,
    %c0_i32_8 = arith.constant 0 : i32
    %12 = arith.cmpi eq, %arg1, %c0_i32_8 : i32
    %13 = arith.extui %12 : i1 to i32
    %c0_i32_9 = arith.constant 0 : i32
    %14 = arith.cmpi ne, %13, %c0_i32_9 : i32
    scf.if %14 {
      %c0_10 = arith.constant 0 : index
      %c0_11 = arith.constant 0 : index
      %15 = vector.load %arg6[%c0_10, %c0_11] : memref<8x1xf32, #tpu.memory_space<vmem>>, vector<8x1xf32>
      %c0_12 = arith.constant 0 : index
      %c0_13 = arith.constant 0 : index
      %16 = memref.load %arg4[%c0_12, %c0_13] : memref<1x1xf32, #tpu.memory_space<smem>>
      %17 = vector.broadcast %16 : f32 to vector<8x1xf32>
      %18 = arith.addf %15, %17 : vector<8x1xf32>
      %cst_14 = arith.constant 5.000000e-01 : f32
      %19 = vector.broadcast %cst_14 : f32 to vector<8x1xf32>
      %20 = arith.mulf %19, %18 : vector<8x1xf32>
      %21 = math.tanh %20 : vector<8x1xf32>
      %cst_15 = arith.constant 1.000000e+00 : f32
      %22 = vector.broadcast %cst_15 : f32 to vector<8x1xf32>
      %23 = arith.addf %21, %22 : vector<8x1xf32>
      %cst_16 = arith.constant 5.000000e-01 : f32
      %24 = vector.broadcast %cst_16 : f32 to vector<8x1xf32>
      %25 = arith.mulf %24, %23 : vector<8x1xf32>
      %c0_17 = arith.constant 0 : index
      %c0_18 = arith.constant 0 : index
      %26 = vector.load %arg5[%c0_17, %c0_18] : memref<8x1xf32, #tpu.memory_space<vmem>>, vector<8x1xf32>
      tpu.vector_store %arg5[%c0_17, %c0_18], %25 {strides = array<i32>} : memref<8x1xf32, #tpu.memory_space<vmem>>, vector<8x1xf32>,
    } else {
    }
    return
  }
  func.func @transform_0(%arg0: i32, %arg1: i32) -> (i32, i32) {
    %c0_i32 = arith.constant 0 : i32
    return %arg0, %arg1 : i32, i32
  }
  func.func @transform_1(%arg0: i32, %arg1: i32) -> (i32, i32) {
    %c0_i32 = arith.constant 0 : i32
    %c0_i32_0 = arith.constant 0 : i32
    return %c0_i32, %arg1 : i32, i32
  }
  func.func @transform_2(%arg0: i32, %arg1: i32) -> (i32, i32) {
    %c0_i32 = arith.constant 0 : i32
    %c0_i32_0 = arith.constant 0 : i32
    %c0_i32_1 = arith.constant 0 : i32
    return %c0_i32, %c0_i32_0 : i32, i32
  }
  func.func @transform_3(%arg0: i32, %arg1: i32) -> (i32, i32) {
    %c0_i32 = arith.constant 0 : i32
    %c0_i32_0 = arith.constant 0 : i32
    return %arg0, %c0_i32 : i32, i32
  }
}

</mosaic_0001>

<bundles_post_ra>
// kernel: tpu_custom_call.1
= control target key start
LH: loop header
LB: loop body
LE: loop exit
PB: predicated region body
PF: predicated region fallthrough
CT: control target
= control target key end

     0   :  { %9 = vsyncpa [#allocation5], 0  ;;  %s97_s15 = smov [#allocation4]   ;;  %s134_s0 = inlined_call_operand.hbm [shape: f32[8,32], index: 0, kind: input, shape index: {}]   ;;  %s135_s1 = inlined_call_operand.vmem [shape: f32[1,32], index: 1, kind: input, shape index: {}]   ;;  %s136_s2 = inlined_call_operand.<no memory space> [shape: f32[1,1], index: 2, kind: input, shape index: {}]   ;;  %s137_s3 = inlined_call_operand.vmem [shape: f32[8,1], index: 3, kind: output, shape index: {}]  }
   0x1   :  { %s15_s14 = sshll.u32 %s134_s0, 4  ;;  %s17_s16 = sshll.u32 %s97_s15, 4  ;;  %s16_s14 = int_to_ptr.hbm [resolvable:$true] %s15_s14  ;;  %s18_s16 = int_to_ptr.vmem [resolvable:$true] %s17_s16 }
   0x2   :  { %20 = dma.hbm_to_vmem [thread:$0]  %s16_s14, 128, %s18_s16, [#allocation5]  }
   0x3   :  { %95 = dma.done.wait [#allocation5], 128  }
   0x4   :  { %96 = vsyncadd [#allocation5], 4294967168  ;;  %vm33_vm0 = vcmask 7168   ;;  %v98_v0 = vmov 0.0   ;;  %v35_v1 = vld [vmem:[#allocation4] sm:$0xff]  ;;  %vm42_vm1 = vcmask 261120   ;;  %v54_v8 = vstv %s136_s2 }
   0x5   :  { %34 = vst.msk [vmem:[#allocation2] sm:$0xff] %vm33_vm0, %v98_v0  ;;  %v68_v2 = vld [vmem:[%s135_s1] ss:$0 sm:$0xff] }
   0x6   :  { %v40_v3 = vmul.f32 %v68_v2, %v35_v1 }
   0x8   :  { %v43_v4 = vsel %vm42_vm1, %v40_v3, 0.0 }
   0x9   :  { %44 = vadd.xlane.f32.xlu0 %v43_v4 }
   0xc   :  { %v41_v5 = vld [vmem:[#allocation2] sm:$0xff] }
  0x7c   :  { %v45_v6 = vpop.xlane.xlu0 %44 }
  0x7d   :  { %v46_v7 = vadd.f32 %v45_v6, %v41_v5 }
  0x7f   :  { %48 = vst.msk [vmem:[#allocation2] sm:$0xff] %vm33_vm0, %v46_v7 }
  0x86   :  { %v52_v9 = vld [vmem:[#allocation2] sm:$0xff] }
  0x87   :  { %v55_v10 = vadd.f32 %v54_v8, %v52_v9 }
  0x89   :  { %v56_v11 = vmul.f32 0.5, %v55_v10 }
  0x8b   :  { %69 = vtanh.f32 %v56_v11 }
  0x91   :  { %v70_v12 = vpop.eup %69 }
  0x92   :  { %v58_v13 = vadd.f32 1.0, %v70_v12 }
  0x94   :  { %v59_v14 = vmul.f32 0.5, %v58_v13 }
  0x96   :  { %60 = vst.msk [vmem:[%s137_s3] sm:$0xff] %vm33_vm0, %v59_v14 }
  0x97   :  { %65 = vsyncpa [#allocation5], 1 }

</bundles_post_ra>
